<compile_context>
chip_gen: v6e
topology: v6e:2x2x1
jax: 0.10.0
libtpu: 0.0.40
codegen_flags: <defaults>
</compile_context>

<pallas_src>
import jax
import jax.numpy as jnp
from jax import lax
from jax.experimental import pallas as pl
from jax.experimental.pallas import tpu as pltpu

GROUP_SIZE = 2  # cyclic group of order 2 (eq_word_indices = [2, 7])


def _equi_att_kernel(ids_ref, Efold_ref, pos_ref, W1_ref, b1_ref,
                     Wlm_ref, blm_ref, Wqkv_ref, bqkv_ref, out_ref):
    f32 = jnp.float32
    G, V, H = Efold_ref.shape
    S = pos_ref.shape[0]
    VPAD = Wqkv_ref.shape[-1] // 3

    # ---- hoisted loop-invariant loads (read each ref exactly once) ----
    pos = pos_ref[...]                 # [S, H]
    W1 = W1_ref[...]                   # [H, H]
    b1 = b1_ref[...]                   # [1, H]
    Wlm = Wlm_ref[...]                 # [H, V]
    blm = blm_ref[...]                 # [1, V]
    bqkv = bqkv_ref[...]               # [1, 3*VPAD]

    # ---- token one-hot built in-kernel from int32 ids (no HBM one-hot) ----
    ids = ids_ref[0]                   # [S, 1] int32 for this batch element
    onehot = (lax.broadcasted_iota(jnp.int32, (S, V), 1) == ids).astype(f32)  # [S, V]

    # ---- g_transform_data + embedding: onehot @ (P_g @ E) == E[perm_g(id)] ----
    rows = [jnp.dot(onehot, Efold_ref[g], preferred_element_type=f32) + pos
            for g in range(G)]
    x = jnp.concatenate(rows, axis=0)                                   # [G*S, H]

    # ---- pre_model (shared weights, single matmul over the stacked group axis) ----
    h1 = jnp.tanh(jnp.dot(x, W1, preferred_element_type=f32) + b1)      # [G*S, H]
    lt = jnp.dot(h1, Wlm, preferred_element_type=f32) + blm             # [G*S, V]

    # ---- g_inv_transform folded into fused, lane-padded Q|K|V projections ----
    qkv = jnp.stack(
        [jnp.dot(lt[g * S:(g + 1) * S], Wqkv_ref[g],
                 preferred_element_type=f32) + bqkv for g in range(G)],
        axis=0)                                                          # [G, S, 3*VPAD]
    q = qkv[:, :, 0:VPAD]
    k = qkv[:, :, VPAD:2 * VPAD]
    v = qkv[:, :, 2 * VPAD:3 * VPAD]

    # ---- AttentionAggregation over the group axis (softmax over h, mean over g) ----
    scale = 1.0 / (float(V) ** 0.5)    # real vocab width (padding columns are zero)
    scores = jnp.sum(q[:, None] * k[None, :], axis=-1, keepdims=True) * scale  # [G,G,S,1]
    m = jnp.max(scores, axis=1, keepdims=True)                                  # [G,1,S,1]
    e = jnp.exp(scores - m)
    denom = jnp.sum(e, axis=1, keepdims=True)
    attn = e * pl.reciprocal(denom, approx=True)                                # [G,G,S,1]
    wsum = jnp.sum(attn * v[None], axis=1)                                      # [G,S,VPAD]
    out_ref[0] = jnp.mean(wsum, axis=0)                                         # [S,VPAD]


def equi_att_llm_forward(input_ids, labels, params):
    """Returns [loss, logits] like EquiAttLLM.forward."""
    (Pm, Pinv, E, pos, W1, b1, Wlm, blm, Wq, bq, Wk, bk, Wv, bv) = params
    B, S = input_ids.shape
    V, H = E.shape
    G = Pm.shape[0]
    VPAD = ((V + 127) // 128) * 128   # lane-dense vocab padding

    # ---- exact algebraic folds done once on the host ----
    # g_transform_data:  onehot @ P_g @ E  ==  onehot @ (P_g @ E)
    E_fold = jnp.einsum('gij,jh->gih', Pm, E)                       # [G, V, H]

    # g_inv_transform_prob + Q/K/V projection:  (lt @ Pinv_g) @ W  ==  lt @ (Pinv_g @ W)
    def fold_pad(w):
        wf = jnp.einsum('gij,jk->gik', Pinv, w)                     # [G, V, V]
        return jnp.pad(wf, ((0, 0), (0, 0), (0, VPAD - V)))

    def pad_bias(b):
        return jnp.pad(b, ((0, 0), (0, VPAD - V)))

    Wqkv = jnp.concatenate([fold_pad(Wq), fold_pad(Wk), fold_pad(Wv)], axis=-1)  # [G,V,3*VPAD]
    bqkv = jnp.concatenate([pad_bias(bq), pad_bias(bk), pad_bias(bv)], axis=-1)  # [1,3*VPAD]

    ids3 = input_ids.astype(jnp.int32).reshape(B, S, 1)

    def full_spec(shape):
        return pl.BlockSpec(shape, lambda b, n=len(shape): (0,) * n)

    grid_spec = pltpu.PrefetchScalarGridSpec(
        num_scalar_prefetch=0,
        grid=(B,),
        in_specs=[
            pl.BlockSpec((1, S, 1), lambda b: (b, 0, 0)),   # token ids (int32)
            full_spec((G, V, H)),                           # P_g @ E
            full_spec((S, H)),                              # positional
            full_spec((H, H)), full_spec((1, H)),           # MLP
            full_spec((H, V)), full_spec((1, V)),           # LM head
            full_spec((G, V, 3 * VPAD)),                    # fused Pinv_g @ [Wq|Wk|Wv], padded
            full_spec((1, 3 * VPAD)),                       # fused [bq|bk|bv], padded
        ],
        out_specs=pl.BlockSpec((1, S, VPAD), lambda b: (b, 0, 0)),
    )

    flops = int(B * (2 * G * S * V * H            # embedding
                     + 2 * G * S * H * H          # MLP
                     + 2 * G * S * H * V          # LM head
                     + 2 * G * S * V * 3 * VPAD   # fused Q/K/V
                     + 4 * G * G * S * VPAD))     # attention scores + weighted sum
    transcendentals = int(B * (G * S * H + G * G * S + G * S))
    bytes_accessed = int(ids3.size * 4 + E_fold.size * 4 + pos.size * 4
                         + W1.size * 4 + b1.size * 4 + Wlm.size * 4 + blm.size * 4
                         + Wqkv.size * 4 + bqkv.size * 4 + B * S * VPAD * 4)

    padded_logits = pl.pallas_call(
        _equi_att_kernel,
        out_shape=jax.ShapeDtypeStruct((B, S, VPAD), jnp.float32),
        grid_spec=grid_spec,
        compiler_params=pltpu.CompilerParams(dimension_semantics=("parallel",)),
        cost_estimate=pl.CostEstimate(flops=flops,
                                      transcendentals=transcendentals,
                                      bytes_accessed=bytes_accessed),
    )(ids3, E_fold, pos, W1, b1, Wlm, blm, Wqkv, bqkv)

    logits = padded_logits[:, :, :V]

    # compute_loss: CrossEntropyLoss(logits.permute(0,2,1)[:, :, :-1], labels[:, 1:])
    if labels is not None:
        logp = jax.nn.log_softmax(logits, axis=-1)
        lp = logp[:, :-1, :]                                  # positions 0..S-2
        lab = labels[:, 1:]                                   # targets 1..S-1
        nll = -jnp.take_along_axis(lp, lab[..., None], axis=-1)[..., 0]
        loss = nll.mean()
    else:
        loss = jnp.float32(0.0)
    return loss, logits


if __name__ == "__main__":
    VOCAB, GROUP, HIDDEN, SEQ, BATCH = 8, GROUP_SIZE, 32, 8, 2
    EQ_WORD_INDICES = [2, 7]

    # cyclic_group_generator / cyclic_group: permutations cycling the equivariant word ids
    perms = []
    for kcyc in range(GROUP):
        p = list(range(VOCAB))
        for j, w in enumerate(EQ_WORD_INDICES):
            p[w] = EQ_WORD_INDICES[(j + kcyc) % len(EQ_WORD_INDICES)]
        perms.append(p)
    Pm = jnp.stack([jax.nn.one_hot(jnp.array(p), VOCAB, dtype=jnp.float32) for p in perms])  # [G,V,V]
    Pinv = jnp.transpose(Pm, (0, 2, 1))                     # inverse permutation matrices

    key = jax.random.PRNGKey(0)
    ks = jax.random.split(key, 16)

    def norm(k, shape, scale=0.1):
        return (scale * jax.random.normal(k, shape)).astype(jnp.float32)

    E = norm(ks[0], (VOCAB, HIDDEN))
    pos = norm(ks[1], (SEQ, HIDDEN))
    W1 = norm(ks[2], (HIDDEN, HIDDEN))
    b1 = norm(ks[3], (1, HIDDEN))
    Wlm = norm(ks[4], (HIDDEN, VOCAB))
    blm = norm(ks[5], (1, VOCAB))
    Wq = norm(ks[6], (VOCAB, VOCAB)); bq = norm(ks[7], (1, VOCAB))
    Wk = norm(ks[8], (VOCAB, VOCAB)); bk = norm(ks[9], (1, VOCAB))
    Wv = norm(ks[10], (VOCAB, VOCAB)); bv = norm(ks[11], (1, VOCAB))

    input_ids = jax.random.randint(ks[12], (BATCH, SEQ), 0, VOCAB)
    labels = jax.random.randint(ks[13], (BATCH, SEQ), 0, VOCAB)

    params = (Pm, Pinv, E, pos, W1, b1, Wlm, blm, Wq, bq, Wk, bk, Wv, bv)
    loss, logits = equi_att_llm_forward(input_ids, labels, params)
    jax.block_until_ready((loss, logits))
    assert logits.shape == (BATCH, SEQ, VOCAB)
    print("KERNEL_OK")
</pallas_src>

<mosaic_0001>
module attributes {stable_mosaic.version = 11 : i64} {
  func.func @_equi_att_kernel(%arg0: i32, %arg1: memref<1x8x1xi32, #tpu.memory_space<vmem>>, %arg2: memref<2x8x32xf32, #tpu.memory_space<vmem>>, %arg3: memref<8x32xf32, #tpu.memory_space<vmem>>, %arg4: memref<32x32xf32, #tpu.memory_space<vmem>>, %arg5: memref<1x32xf32, #tpu.memory_space<vmem>>, %arg6: memref<32x8xf32, #tpu.memory_space<vmem>>, %arg7: memref<1x8xf32, #tpu.memory_space<vmem>>, %arg8: memref<2x8x384xf32, #tpu.memory_space<vmem>>, %arg9: memref<1x384xf32, #tpu.memory_space<vmem>>, %arg10: memref<1x8x128xf32, #tpu.memory_space<vmem>>) attributes {dimension_semantics = [#tpu.dimension_semantics<parallel>], iteration_bounds = array<i64: 2>, scalar_prefetch = 0 : i64, scratch_operands = 0 : i64, tpu.core_type = #tpu.core_type<tc>, window_params = [{transform_indices = @transform_0, window_bounds = array<i64: 1, 8, 1>}, {pipeline_mode = #tpu.pipeline_mode<synchronous>, transform_indices = @transform_1, window_bounds = array<i64: 2, 8, 32>}, {pipeline_mode = #tpu.pipeline_mode<synchronous>, transform_indices = @transform_2, window_bounds = array<i64: 8, 32>}, {pipeline_mode = #tpu.pipeline_mode<synchronous>, transform_indices = @transform_3, window_bounds = array<i64: 32, 32>}, {pipeline_mode = #tpu.pipeline_mode<synchronous>, transform_indices = @transform_4, window_bounds = array<i64: 1, 32>}, {pipeline_mode = #tpu.pipeline_mode<synchronous>, transform_indices = @transform_5, window_bounds = array<i64: 32, 8>}, {pipeline_mode = #tpu.pipeline_mode<synchronous>, transform_indices = @transform_6, window_bounds = array<i64: 1, 8>}, {pipeline_mode = #tpu.pipeline_mode<synchronous>, transform_indices = @transform_7, window_bounds = array<i64: 2, 8, 384>}, {pipeline_mode = #tpu.pipeline_mode<synchronous>, transform_indices = @transform_8, window_bounds = array<i64: 1, 384>}, {transform_indices = @transform_9, window_bounds = array<i64: 1, 8, 128>}]} {
    %c0 = arith.constant 0 : index
    %c0_0 = arith.constant 0 : index
    %0 = vector.load %arg3[%c0, %c0_0] : memref<8x32xf32, #tpu.memory_space<vmem>>, vector<8x32xf32>
    %c0_1 = arith.constant 0 : index
    %c0_2 = arith.constant 0 : index
    %1 = vector.load %arg4[%c0_1, %c0_2] : memref<32x32xf32, #tpu.memory_space<vmem>>, vector<32x32xf32>
    %c0_3 = arith.constant 0 : index
    %c0_4 = arith.constant 0 : index
    %2 = vector.load %arg5[%c0_3, %c0_4] : memref<1x32xf32, #tpu.memory_space<vmem>>, vector<1x32xf32>
    %c0_5 = arith.constant 0 : index
    %c0_6 = arith.constant 0 : index
    %3 = vector.load %arg6[%c0_5, %c0_6] : memref<32x8xf32, #tpu.memory_space<vmem>>, vector<32x8xf32>
    %c0_7 = arith.constant 0 : index
    %c0_8 = arith.constant 0 : index
    %4 = vector.load %arg7[%c0_7, %c0_8] : memref<1x8xf32, #tpu.memory_space<vmem>>, vector<1x8xf32>
    %c0_9 = arith.constant 0 : index
    %c0_10 = arith.constant 0 : index
    %5 = vector.load %arg9[%c0_9, %c0_10] : memref<1x384xf32, #tpu.memory_space<vmem>>, vector<1x384xf32>
    %c0_11 = arith.constant 0 : index
    %c0_12 = arith.constant 0 : index
    %c0_13 = arith.constant 0 : index
    %6 = vector.load %arg1[%c0_11, %c0_12, %c0_13] : memref<1x8x1xi32, #tpu.memory_space<vmem>>, vector<1x8x1xi32>
    %7 = vector.shape_cast %6 : vector<1x8x1xi32> to vector<8x1xi32>
    %8 = tpu.iota {dimensions = array<i32: 1>} : vector<8x8xi32>
    %9 = vector.broadcast %7 : vector<8x1xi32> to vector<8x8xi32>
    %10 = arith.cmpi eq, %8, %9 : vector<8x8xi32>
    %11 = arith.extui %10 : vector<8x8xi1> to vector<8x8xi32>
    %12 = arith.sitofp %11 : vector<8x8xi32> to vector<8x8xf32>
    %c0_14 = arith.constant 0 : index
    %c0_15 = arith.constant 0 : index
    %c0_16 = arith.constant 0 : index
    %13 = vector.load %arg2[%c0_14, %c0_15, %c0_16] : memref<2x8x32xf32, #tpu.memory_space<vmem>>, vector<1x8x32xf32>
    %14 = vector.shape_cast %13 : vector<1x8x32xf32> to vector<8x32xf32>
    %cst = arith.constant dense<0.000000e+00> : vector<8x32xf32>
    %15 = tpu.matmul %12, %14, %cst {dimension_numbers = #tpu.dot_dimension_numbers<[1], [0], [0], [1], [0, 0, 1, 1], [], []>} : vector<8x8xf32>, vector<8x32xf32>, vector<8x32xf32> -> vector<8x32xf32>
    %16 = arith.addf %15, %0 : vector<8x32xf32>
    %c1 = arith.constant 1 : index
    %c0_17 = arith.constant 0 : index
    %c0_18 = arith.constant 0 : index
    %17 = vector.load %arg2[%c1, %c0_17, %c0_18] : memref<2x8x32xf32, #tpu.memory_space<vmem>>, vector<1x8x32xf32>
    %18 = vector.shape_cast %17 : vector<1x8x32xf32> to vector<8x32xf32>
    %cst_19 = arith.constant dense<0.000000e+00> : vector<8x32xf32>
    %19 = tpu.matmul %12, %18, %cst_19 {dimension_numbers = #tpu.dot_dimension_numbers<[1], [0], [0], [1], [0, 0, 1, 1], [], []>} : vector<8x8xf32>, vector<8x32xf32>, vector<8x32xf32> -> vector<8x32xf32>
    %20 = arith.addf %19, %0 : vector<8x32xf32>
    %21 = tpu.concatenate %16, %20 in 0 : vector<8x32xf32>, vector<8x32xf32> -> vector<16x32xf32>
    %cst_20 = arith.constant dense<0.000000e+00> : vector<16x32xf32>
    %22 = tpu.matmul %21, %1, %cst_20 {dimension_numbers = #tpu.dot_dimension_numbers<[1], [0], [0], [1], [0, 0, 1, 1], [], []>} : vector<16x32xf32>, vector<32x32xf32>, vector<16x32xf32> -> vector<16x32xf32>
    %23 = vector.broadcast %2 : vector<1x32xf32> to vector<16x32xf32>
    %24 = arith.addf %22, %23 : vector<16x32xf32>
    %25 = math.tanh %24 : vector<16x32xf32>
    %cst_21 = arith.constant dense<0.000000e+00> : vector<16x8xf32>
    %26 = tpu.matmul %25, %3, %cst_21 {dimension_numbers = #tpu.dot_dimension_numbers<[1], [0], [0], [1], [0, 0, 1, 1], [], []>} : vector<16x32xf32>, vector<32x8xf32>, vector<16x8xf32> -> vector<16x8xf32>
    %27 = vector.broadcast %4 : vector<1x8xf32> to vector<16x8xf32>
    %28 = arith.addf %26, %27 : vector<16x8xf32>
    %29 = vector.extract_strided_slice %28 {offsets = [0, 0], sizes = [8, 8], strides = [1, 1]} : vector<16x8xf32> to vector<8x8xf32>
    %c0_22 = arith.constant 0 : index
    %c0_23 = arith.constant 0 : index
    %c0_24 = arith.constant 0 : index
    %30 = vector.load %arg8[%c0_22, %c0_23, %c0_24] : memref<2x8x384xf32, #tpu.memory_space<vmem>>, vector<1x8x384xf32>
    %31 = vector.shape_cast %30 : vector<1x8x384xf32> to vector<8x384xf32>
    %cst_25 = arith.constant dense<0.000000e+00> : vector<8x384xf32>
    %32 = tpu.matmul %29, %31, %cst_25 {dimension_numbers = #tpu.dot_dimension_numbers<[1], [0], [0], [1], [0, 0, 1, 1], [], []>} : vector<8x8xf32>, vector<8x384xf32>, vector<8x384xf32> -> vector<8x384xf32>
    %33 = vector.broadcast %5 : vector<1x384xf32> to vector<8x384xf32>
    %34 = arith.addf %32, %33 : vector<8x384xf32>
    %35 = vector.extract_strided_slice %28 {offsets = [8, 0], sizes = [8, 8], strides = [1, 1]} : vector<16x8xf32> to vector<8x8xf32>
    %c1_26 = arith.constant 1 : index
    %c0_27 = arith.constant 0 : index
    %c0_28 = arith.constant 0 : index
    %36 = vector.load %arg8[%c1_26, %c0_27, %c0_28] : memref<2x8x384xf32, #tpu.memory_space<vmem>>, vector<1x8x384xf32>
    %37 = vector.shape_cast %36 : vector<1x8x384xf32> to vector<8x384xf32>
    %cst_29 = arith.constant dense<0.000000e+00> : vector<8x384xf32>
    %38 = tpu.matmul %35, %37, %cst_29 {dimension_numbers = #tpu.dot_dimension_numbers<[1], [0], [0], [1], [0, 0, 1, 1], [], []>} : vector<8x8xf32>, vector<8x384xf32>, vector<8x384xf32> -> vector<8x384xf32>
    %39 = vector.broadcast %5 : vector<1x384xf32> to vector<8x384xf32>
    %40 = arith.addf %38, %39 : vector<8x384xf32>
    %41 = vector.shape_cast %34 : vector<8x384xf32> to vector<1x8x384xf32>
    %42 = vector.shape_cast %40 : vector<8x384xf32> to vector<1x8x384xf32>
    %43 = tpu.concatenate %41, %42 in 0 : vector<1x8x384xf32>, vector<1x8x384xf32> -> vector<2x8x384xf32>
    %44 = vector.extract_strided_slice %43 {offsets = [0, 0, 0], sizes = [2, 8, 128], strides = [1, 1, 1]} : vector<2x8x384xf32> to vector<2x8x128xf32>
    %45 = vector.extract_strided_slice %43 {offsets = [0, 0, 128], sizes = [2, 8, 128], strides = [1, 1, 1]} : vector<2x8x384xf32> to vector<2x8x128xf32>
    %46 = vector.extract_strided_slice %43 {offsets = [0, 0, 256], sizes = [2, 8, 128], strides = [1, 1, 1]} : vector<2x8x384xf32> to vector<2x8x128xf32>
    %47 = vector.shape_cast %44 : vector<2x8x128xf32> to vector<2x1x8x128xf32>
    %48 = vector.shape_cast %45 : vector<2x8x128xf32> to vector<1x2x8x128xf32>
    %49 = vector.broadcast %47 : vector<2x1x8x128xf32> to vector<2x2x8x128xf32>
    %50 = vector.broadcast %48 : vector<1x2x8x128xf32> to vector<2x2x8x128xf32>
    %51 = arith.mulf %49, %50 : vector<2x2x8x128xf32>
    %cst_30 = arith.constant dense<0.000000e+00> : vector<2x2x8xf32>
    %52 = vector.multi_reduction <add>, %51, %cst_30 [3] : vector<2x2x8x128xf32> to vector<2x2x8xf32>
    %53 = vector.shape_cast %52 : vector<2x2x8xf32> to vector<2x2x8x1xf32>
    %cst_31 = arith.constant 0.353553385 : f32
    %54 = vector.broadcast %cst_31 : f32 to vector<2x2x8x1xf32>
    %55 = arith.mulf %53, %54 : vector<2x2x8x1xf32>
    %cst_32 = arith.constant dense<0xFF800000> : vector<2x8x1xf32>
    %56 = vector.multi_reduction <maximumf>, %55, %cst_32 [1] : vector<2x2x8x1xf32> to vector<2x8x1xf32>
    %57 = vector.shape_cast %56 : vector<2x8x1xf32> to vector<2x1x8x1xf32>
    %58 = vector.broadcast %57 : vector<2x1x8x1xf32> to vector<2x2x8x1xf32>
    %59 = arith.subf %55, %58 : vector<2x2x8x1xf32>
    %60 = math.exp %59 : vector<2x2x8x1xf32>
    %cst_33 = arith.constant dense<0.000000e+00> : vector<2x8x1xf32>
    %61 = vector.multi_reduction <add>, %60, %cst_33 [1] : vector<2x2x8x1xf32> to vector<2x8x1xf32>
    %62 = vector.shape_cast %61 : vector<2x8x1xf32> to vector<2x1x8x1xf32>
    %63 = tpu.reciprocal %62 {approx = true} : vector<2x1x8x1xf32> -> vector<2x1x8x1xf32>
    %64 = vector.broadcast %63 : vector<2x1x8x1xf32> to vector<2x2x8x1xf32>
    %65 = arith.mulf %60, %64 : vector<2x2x8x1xf32>
    %66 = vector.shape_cast %46 : vector<2x8x128xf32> to vector<1x2x8x128xf32>
    %67 = vector.broadcast %65 : vector<2x2x8x1xf32> to vector<2x2x8x128xf32>
    %68 = vector.broadcast %66 : vector<1x2x8x128xf32> to vector<2x2x8x128xf32>
    %69 = arith.mulf %67, %68 : vector<2x2x8x128xf32>
    %cst_34 = arith.constant dense<0.000000e+00> : vector<2x8x128xf32>
    %70 = vector.multi_reduction <add>, %69, %cst_34 [1] : vector<2x2x8x128xf32> to vector<2x8x128xf32>
    %cst_35 = arith.constant dense<0.000000e+00> : vector<8x128xf32>
    %71 = vector.multi_reduction <add>, %70, %cst_35 [0] : vector<2x8x128xf32> to vector<8x128xf32>
    %cst_36 = arith.constant 2.000000e+00 : f32
    %72 = vector.broadcast %cst_36 : f32 to vector<8x128xf32>
    %73 = arith.divf %71, %72 : vector<8x128xf32>
    %c0_37 = arith.constant 0 : index
    %c0_38 = arith.constant 0 : index
    %c0_39 = arith.constant 0 : index
    %74 = vector.load %arg10[%c0_37, %c0_38, %c0_39] : memref<1x8x128xf32, #tpu.memory_space<vmem>>, vector<1x8x128xf32>
    %75 = vector.shape_cast %74 : vector<1x8x128xf32> to vector<8x128xf32>
    %76 = vector.shape_cast %73 : vector<8x128xf32> to vector<1x8x128xf32>
    tpu.vector_store %arg10[%c0_37, %c0_38, %c0_39], %76 {strides = array<i32>} : memref<1x8x128xf32, #tpu.memory_space<vmem>>, vector<1x8x128xf32>,
    return
  }
  func.func @transform_0(%arg0: i32) -> (i32, i32, i32) {
    %c0_i32 = arith.constant 0 : i32
    %c0_i32_0 = arith.constant 0 : i32
    %c0_i32_1 = arith.constant 0 : i32
    return %arg0, %c0_i32, %c0_i32_0 : i32, i32, i32
  }
  func.func @transform_1(%arg0: i32) -> (i32, i32, i32) {
    %c0_i32 = arith.constant 0 : i32
    %c0_i32_0 = arith.constant 0 : i32
    %c0_i32_1 = arith.constant 0 : i32
    %c0_i32_2 = arith.constant 0 : i32
    return %c0_i32, %c0_i32_0, %c0_i32_1 : i32, i32, i32
  }
  func.func @transform_2(%arg0: i32) -> (i32, i32) {
    %c0_i32 = arith.constant 0 : i32
    %c0_i32_0 = arith.constant 0 : i32
    %c0_i32_1 = arith.constant 0 : i32
    return %c0_i32, %c0_i32_0 : i32, i32
  }
  func.func @transform_3(%arg0: i32) -> (i32, i32) {
    %c0_i32 = arith.constant 0 : i32
    %c0_i32_0 = arith.constant 0 : i32
    %c0_i32_1 = arith.constant 0 : i32
    return %c0_i32, %c0_i32_0 : i32, i32
  }
  func.func @transform_4(%arg0: i32) -> (i32, i32) {
    %c0_i32 = arith.constant 0 : i32
    %c0_i32_0 = arith.constant 0 : i32
    %c0_i32_1 = arith.constant 0 : i32
    return %c0_i32, %c0_i32_0 : i32, i32
  }
  func.func @transform_5(%arg0: i32) -> (i32, i32) {
    %c0_i32 = arith.constant 0 : i32
    %c0_i32_0 = arith.constant 0 : i32
    %c0_i32_1 = arith.constant 0 : i32
    return %c0_i32, %c0_i32_0 : i32, i32
  }
  func.func @transform_6(%arg0: i32) -> (i32, i32) {
    %c0_i32 = arith.constant 0 : i32
    %c0_i32_0 = arith.constant 0 : i32
    %c0_i32_1 = arith.constant 0 : i32
    return %c0_i32, %c0_i32_0 : i32, i32
  }
  func.func @transform_7(%arg0: i32) -> (i32, i32, i32) {
    %c0_i32 = arith.constant 0 : i32
    %c0_i32_0 = arith.constant 0 : i32
    %c0_i32_1 = arith.constant 0 : i32
    %c0_i32_2 = arith.constant 0 : i32
    return %c0_i32, %c0_i32_0, %c0_i32_1 : i32, i32, i32
  }
  func.func @transform_8(%arg0: i32) -> (i32, i32) {
    %c0_i32 = arith.constant 0 : i32
    %c0_i32_0 = arith.constant 0 : i32
    %c0_i32_1 = arith.constant 0 : i32
    return %c0_i32, %c0_i32_0 : i32, i32
  }
  func.func @transform_9(%arg0: i32) -> (i32, i32, i32) {
    %c0_i32 = arith.constant 0 : i32
    %c0_i32_0 = arith.constant 0 : i32
    %c0_i32_1 = arith.constant 0 : i32
    return %arg0, %c0_i32, %c0_i32_0 : i32, i32, i32
  }
}

</mosaic_0001>

<bundles_post_ra>
// kernel: tpu_custom_call.1
= control target key start
LH: loop header
LB: loop body
LE: loop exit
PB: predicated region body
PF: predicated region fallthrough
CT: control target
= control target key end

     0   :  { %14 = vsyncpa [#allocation3], 0  ;;  %s1710_s0 = inlined_call_operand.vmem [shape: s32[2,8,1], index: 0, kind: input, shape index: {}]   ;;  %s1711_s1 = inlined_call_operand.vmem [shape: f32[2,8,32], index: 1, kind: input, shape index: {}]   ;;  %s1712_s2 = inlined_call_operand.hbm [shape: f32[8,32], index: 2, kind: input, shape index: {}]   ;;  %s1713_s3 = inlined_call_operand.hbm [shape: f32[32,32], index: 3, kind: input, shape index: {}]   ;;  %s1714_s4 = inlined_call_operand.vmem [shape: f32[1,32], index: 4, kind: input, shape index: {}]   ;;  %s1715_s5 = inlined_call_operand.vmem [shape: f32[32,8], index: 5, kind: input, shape index: {}]   ;;  %s1716_s6 = inlined_call_operand.vmem [shape: f32[1,8], index: 6, kind: input, shape index: {}]   ;;  %s1717_s7 = inlined_call_operand.vmem [shape: f32[2,8,384], index: 7, kind: input, shape index: {}]   ;;  %s1718_s8 = inlined_call_operand.vmem [shape: f32[1,384], index: 8, kind: input, shape index: {}]   ;;  %s1719_s9 = inlined_call_operand.hbm [shape: f32[2,8,128], index: 9, kind: output, shape index: {}]  }
   0x1   :  { %15 = vsyncpa [#allocation6], 0 }
   0x2   :  { %16 = vsyncpa [#allocation4], 0 }
   0x3   :  { %18 = vsyncpa [#allocation4 + $0x1], 0  ;;  %s1510_s30 = smov 0   ;;  %s1512_s10 = smov 0  }
   0x4   :  { %s1514_s11 = smov 0   ;;  %s1516_s12 = smov 0  }
   0x5 LB: > { %s1531_s13 = sadd.s32 4294967295, %s1450_s12   ;;  %s1155_s14 = sadd.s32 4294967294, %s1450_s12   ;;  %s1450_s12 = sphi %s1516_s12, %s1737_s12   ;;  %s1446_s11 = sphi %s1514_s11, %s1736_s11   ;;  %s1442_s10 = sphi %s1512_s10, %s1735_s10   ;;  %s1438_s30 = sphi %s1510_s30, %s1734_s30  }
   0x6   : > { %s1535_s15 = sadd.s32 1, %s1450_s12   ;;  %s225_s16 = sadd.s32 1, %s1446_s11 }
   0x7   : > { %s222_s17 = ssub.s32 %s1450_s12, %s1535_s15  ;;  %p235_p0 = scmp.ne.s32.totalorder %s1446_s11, %s1442_s10 }
   0x8   : > { %p223_p1 = scmp.eq.s32.totalorder %s222_s17, 0  ;;  %p236_p2 = scmp.eq.s32.totalorder %s1531_s13, 1 }
   0x9   : > { %p241_p3 = scmp.ne.s32.totalorder %s1442_s10, %s1438_s30  ;;  %p242_p4 = scmp.eq.s32.totalorder %s1155_s14, 1 }
   0xa   : > { %s1546_s18 = scalar_select %p223_p1, %s1446_s11, %s225_s16  }
   0xb   : > { %p1548_p5 = por %p236_p2, %p235_p0  ;;  %p1552_p6 = por %p242_p4, %p241_p3 }
   0xc   : > { %p1156_p7 = scmp.ge.s32.totalorder %s1450_s12, 1  ;;  %p249_p8 = scmp.lt.s32.totalorder %s1450_s12, 3 }
   0xd   : > { %s1723_s19 = scalar_select %p1548_p5, 1, 0 }
   0xe   : > { %s1724_s20 = scalar_select %p1552_p6, 1, 0 }
   0xf   : > { %p1720_p9 = scmp.eq.s32.totalorder %s1531_s13, 0  ;;  %p1559_p10 = pnand %p1156_p7, %p249_p8 }
  0x10   : > { %s1452_s22 = smov [#allocation2]   ;;  %s1453_s24 = smov [#allocation5]  }
  0x11   : > { %s1725_s21 = scalar_select %p1559_p10, 1, 0 }
  0x12   : > { %s265_s23 = sshll.u32 %s1452_s22, 4  ;;  %p1258_p11 = pneg %p1559_p10  ;;  %s266_s23 = int_to_ptr.vmem [resolvable:$true] %s265_s23 }
  0x13   : > { %s275_s25 = sshll.u32 %s1453_s24, 4  ;;  %s1341_s27 = scalar_lea.vmem %s266_s23, 128  ;;  %s276_s25 = int_to_ptr.vmem [resolvable:$true] %s275_s25 }
  0x14   : > { %p1567_p12 = pnand %p1720_p9, %p1258_p11  ;;  %p1342_p0 = scmp.ne.s32.totalorder %s266_s23, %s1341_s27 }
  0x15   : > { %p1349_p3 = scmp.lt.s32.totalorder %s266_s23, %s266_s23  ;;  %p1350_p4 = scmp.lt.s32.totalorder %s1341_s27, %s1341_s27 }
  0x16   : > { %p1332_p13 = pneg %p1567_p12 }
  0x17   : > { %p1351_p7 = por %p1350_p4, %p1349_p3 }
  0x18   : > { %p1344_p1 = pnand %p1342_p0, %p1332_p13 }
  0x1a   : > { %p1345_p2 = pneg %p1344_p1 }
  0x1c   : > { %p1352_p8 = pnand %p1351_p7, %p1345_p2 }
  0x1e   : > { %1355 = shalt.err (!%p1352_p8)
}
  0x1f   : > { %1261 = dma.hbm_to_vmem [thread:$0]  (!%p1567_p12), %s1712_s2, 128, %s266_s23, [#allocation3]  }
  0x20   : > { %s1367_s14 = scalar_lea.vmem %s276_s25, 512  ;;  %p1375_p0 = scmp.lt.s32.totalorder %s276_s25, %s276_s25 }
  0x21   : > { %p1368_p11 = scmp.ne.s32.totalorder %s276_s25, %s1367_s14  ;;  %p1376_p1 = scmp.lt.s32.totalorder %s1367_s14, %s1367_s14 }
  0x23   : > { %p1370_p9 = pnand %p1368_p11, %p1332_p13  ;;  %p1377_p5 = por %p1376_p1, %p1375_p0 }
  0x25   : > { %p1371_p6 = pneg %p1370_p9 }
  0x27   : > { %p1378_p10 = pnand %p1377_p5, %p1371_p6 }
  0x29   : > { %1381 = shalt.err (!%p1378_p10)
}
  0x2a   : > { %s1454_s16 = smov 128   ;;  %s1455_s17 = smov 8  }
  0x2b   : > { %1264 = dma.hbm_to_vmem [thread:$0]  (!%p1567_p12), %s1713_s3, 512, %s276_s25, [#allocation6], %s1454_s16, %s1454_s16, %s1455_s17  }
  0x2c   : > { %p1727_p2 = scmp.ne.s32.totalorder %s1725_s21, 0 }
  0x2d   : > { %p1728_p3 = scmp.eq.s32.totalorder (!%p1727_p2), %s1531_s13, 0 }
  0x2e   : > { %313 = sbr.rel (%p1727_p2) target bundleno = 1202 (0x4b2), region = 56 }
  0x33   : > { %1425 = dma.done.wait (%p1728_p3), [#allocation3], 128   ;;  %p1729_p9 = pmov %p1728_p3 }
  0x34   : > { %p1730_p5 = pmov %p1728_p3 }
  0x35   : > { %1427 = vsyncadd (%p1729_p9), [#allocation3], 4294967168 }
  0x36   : > { %1429 = dma.done.wait (%p1730_p5), [#allocation6], 512   ;;  %p1731_p6 = pmov %p1728_p3 }
  0x37   : > { %p352_p10 = scmp.lt.s32.totalorder %s1531_s13, 1  ;;  %v1456_v0 = vmov 0   ;;  %v1457_v1 = vmov 0.0   ;;  %vm1458_vm0 = vmmov 0   ;;  %v377_v3 = vld [vmem:[%s1711_s1] sm:$0xff]  ;;  %v1167_v4 = vld [vmem:[%s1711_s1 + $0x8] sm:$0xff]  ;;  %v369_v6 = vlaneseq }
  0x38   : > { %1431 = vsyncadd (%p1731_p6), [#allocation6], 4294966784  ;;  %1313 = vset.pattern.permute.xlu0 %v1456_v0  ;;  %1206 = vmatprep.subr.mxu0 %v1457_v1  ;;  %v360_v5 = vld [vmem:[#allocation5 + $0x18] sm:$0xff]  ;;  %vm378_vm1 = vcmask 64512   ;;  %v359_v10 = vld [vmem:[#allocation5 + $0x10] sm:$0xff]  ;;  %vm530_vm3 = vcmask 261120  }
  0x39   : > { %s353_s21 = scalar_select %p352_p10, %s1531_s13, 1  ;;  %1211 = vmatprep.subr.mxu1 %v1457_v1  ;;  %1208 = vmatprep.mubr.msk.f32.mxu0 %vm1458_vm0, %v1457_v1  ;;  %v370_v7 = vand.u32 127, %v369_v6  ;;  %v358_v11 = vld [vmem:[#allocation5 + $0x8] sm:$0xff]  ;;  %v357_v12 = vld [vmem:[#allocation5] sm:$0xff]  ;;  %v356_v13 = vld [vmem:[#allocation2] sm:$0xff]  ;;  %v706_v42 = vshrl.u32 %v369_v6, 7 }
  0x3a   : > { %1213 = vmatprep.mubr.msk.f32.mxu1 %vm1458_vm0, %v1457_v1  ;;  %1207 = vmatpush3.msra.mxu0 %v377_v3  ;;  %v365_v20 = vld [vmem:[%s1715_s5 + $0x18] sm:$0xff]  ;;  %v364_v21 = vld [vmem:[%s1715_s5 + $0x10] sm:$0xff]  ;;  %v363_v22 = vld [vmem:[%s1715_s5 + $0x8] sm:$0xff]  ;;  %s349_s24 = sand.u32 1, %s1442_s10   ;;  %p1732_p13 = scmp.ne.s32.totalorder %s1723_s19, 0 }
  0x3b   : > { %s1164_s23 = sshll.u32 %s353_s21, 3  ;;  %1212 = vmatpush3.msra.mxu1 %v1167_v4  ;;  %1216 = vmatprep.subr.mxu0 %v360_v5  ;;  %v362_v23 = vld [vmem:[%s1715_s5] sm:$0xff]  ;;  %v702_v31 = vld [vmem:[%s1717_s7 + $0x8] sm:$0xff]  ;;  %v703_v33 = vld [vmem:[%s1717_s7 + $0x10] sm:$0xff]  ;;  %v707_v43 = vsub.s32 0, %v706_v42  ;;  %v711_v44 = vsub.s32 1, %v706_v42 }
  0x3c   : > { %s355_s27 = scalar_lea.vmem %s1710_s0, %s1164_s23  ;;  %1227 = vmatprep.subr.mxu1 %v365_v20  ;;  %v1169_v24 = vld [vmem:[%s1714_s4] ss:$0 sm:$0xff]  ;;  %v1177_v39 = vld [vmem:[%s1717_s7 + $0x18] sm:$0xff]  ;;  %v1179_v40 = vld [vmem:[%s1717_s7 + $0x28] sm:$0xff]  ;;  %s1163_s21 = sshll.u32 %s349_s24, 3 }
  0x3d   : > { %v368_v2 = vld [vmem:[%s355_s27] sm:$0xff]  ;;  %s1183_s23 = sshll.u32 %s1531_s13, 7  ;;  %s351_s25 = scalar_lea.vmem [#allocation7], %s1163_s21 }
  0x3e   : > { %372 = vperm.xlu0 %1313, %v368_v2   ;;  %v701_v32 = vld [vmem:[%s1717_s7] sm:$0xff]  ;;  %s1074_s26 = sshll.u32 %s351_s25, 4  ;;  %s1072_s29 = scalar_lea.hbm %s1719_s9, %s1183_s23  ;;  %s1075_s26 = int_to_ptr.vmem [resolvable:$true] %s1074_s26 }
  0x3f   : > { %v1178_v34 = vld [vmem:[%s1717_s7 + $0x20] sm:$0xff]  ;;  %s1061_s14 = scalar_lea.sflag [#allocation4], %s349_s24  ;;  %s1382_s16 = scalar_lea.vmem %s1075_s26, 128 }
  0x40   : > { %v1172_v36 = vld [vmem:[%s1716_s6] ss:$0 sm:$0xff]  ;;  %p1383_p12 = scmp.ne.s32.totalorder %s1075_s26, %s1382_s16  ;;  %s1459_s17 = smov [#allocation7]  }
  0x41   : > { %v367_v45 = vld [vmem:[%s1718_s8] sm:$0x7]  ;;  %s1386_s22 = sshll.u32 %s1459_s17, 4  ;;  %s1387_s22 = int_to_ptr.vmem [resolvable:$false] %s1386_s22 }
  0x42   : > { %v708_v46 = vrot.slane %v367_v45, %v707_v43  ;;  %v712_v47 = vrot.slane %v367_v45, %v711_v44  ;;  %p1384_p4 = pnand %p1383_p12, %p1732_p13  ;;  %s1388_s13 = scalar_lea.vmem %s1387_s22, 256 }
  0x43   : > { %p1389_p8 = scmp.lt.s32.totalorder %s1075_s26, %s1387_s22  ;;  %p1390_p11 = scmp.lt.s32.totalorder %s1388_s13, %s1382_s16 }
  0x44   : > { %p1385_p7 = pneg %p1384_p4 }
  0x45   : > { %p1391_p0 = por %p1390_p11, %p1389_p8 }
  0x47   : > { %p1392_p1 = pnand %p1391_p0, %p1385_p7 }
  0xb9   : > { %v373_v8 = vpop.permute.xlu0 %372 }
  0xba   : > { %vm374_vm2 = vcmp.eq.s32.totalorder %v370_v7, %v373_v8 }
  0xbb   : > { %v1165_v9 = vsel %vm374_vm2, 1.0, %v1457_v1 }
  0xbc   : > { %1209 = vmatmul.mubr.msk.f32.vlgmr.msra.gmra.mxu0 %vm378_vm1, %v1165_v9  ;;  %1214 = vmatmul.mubr.msk.f32.vlgmr.msra.gmra.mxu1 %vm378_vm1, %v1165_v9 }
  0xbd   : > { %1217 = vmatpush3.msra.mxu0 %v360_v5  ;;  %1228 = vmatpush3.msra.mxu1 %v365_v20 }
  0xbe   : > { %1218 = vmatprep.subr.mxu0 %v359_v10  ;;  %1229 = vmatprep.subr.mxu1 %v364_v21 }
  0xbf   : > { %1219 = vmatpush3.msra.mxu0 %v359_v10  ;;  %1230 = vmatpush3.msra.mxu1 %v364_v21 }
  0xc0   : > { %1220 = vmatprep.subr.mxu0 %v358_v11  ;;  %1231 = vmatprep.subr.mxu1 %v363_v22 }
  0xc1   : > { %1221 = vmatpush3.msra.mxu0 %v358_v11  ;;  %1232 = vmatpush3.msra.mxu1 %v363_v22 }
  0xc2   : > { %1222 = vmatprep.subr.mxu0 %v357_v12  ;;  %1233 = vmatprep.subr.mxu1 %v362_v23 }
  0xc3   : > { %1223 = vmatpush3.msra.mxu0 %v357_v12  ;;  %1234 = vmatpush3.msra.mxu1 %v362_v23 }
  0xc4   : > { %1238 = vmatprep.subr.mxu1 %v1457_v1  ;;  %753 = vmatprep.subr.mxu0 %v702_v31 }
 0x17c   : > { %v448_v14 = vpop.f32.mrf.mxu0  ;;  %v520_v15 = vpop.f32.mrf.mxu1 }
 0x17d   : > { %v449_v16 = vadd.f32 %v448_v14, %v356_v13  ;;  %v521_v17 = vadd.f32 %v520_v15, %v356_v13 }
 0x17e   : > { %v1210_v18 = vpop.f32.mrf.mxu0  ;;  %v1215_v19 = vpop.f32.mrf.mxu1 }
 0x17f   : > { %1224 = vmatprep.mubr.msk.f32.mxu0 %vm530_vm3, %v449_v16 }
 0x180   : > { %1225 = vmatmul.mubr.msk.f32.vlgmr.msra.gmra.mxu0 %vm530_vm3, %v521_v17 }
 0x181   : > { %787 = vmatprep.mubr.f32.mxu0 %v1457_v1  ;;  %754 = vmatpush1.msra.mxu0 %v701_v32 }
 0x182   : > { %901 = vmatprep.subr.mxu0 %v1178_v34 }
 0x240   : > { %v1226_v25 = vpop.f32.mrf.mxu0 }
 0x241   : > { %v609_v26 = vadd.f32 %v1226_v25, %v1169_v24 }
 0x242   : > { %v603_v27 = vpop.f32.mrf.mxu0 }
 0x243   : > { %v604_v28 = vadd.f32 %v1169_v24, %v603_v27  ;;  %v715_v24 = vsub.s32 2, %v706_v42 }
 0x245   : > { %1314 = vtanh.f32 %v604_v28  ;;  %v716_v25 = vrot.slane %v367_v45, %v715_v24 }
 0x246   : > { %1316 = vtanh.f32 %v609_v26 }
 0x252   : > { %v1315_v29 = vpop.eup %1314 }
 0x253   : > { %v1317_v30 = vpop.eup %1316  ;;  %1235 = vmatprep.mubr.msk.f32.mxu1 %vm530_vm3, %v1315_v29 }
 0x254   : > { %1236 = vmatmul.mubr.msk.f32.vlgmr.msra.gmra.mxu1 %vm530_vm3, %v1317_v30 }
 0x255   : > { %1240 = vmatprep.mubr.msk.f32.mxu1 %vm1458_vm0, %v1457_v1  ;;  %1239 = vmatpush3.msra.mxu1 %v703_v33 }
 0x256   : > { %1243 = vmatprep.subr.mxu1 %v1457_v1 }
 0x314   : > { %v1237_v35 = vpop.f32.mrf.mxu1 }
 0x315   : > { %v698_v41 = vadd.f32 %v1237_v35, %v1172_v36 }
 0x316   : > { %v692_v37 = vpop.f32.mrf.mxu1 }
 0x317   : > { %v693_v38 = vadd.f32 %v1172_v36, %v692_v37 }
 0x319   : > { %1175 = vmatmul.mubr.msk.f32.vlgmr.msra.gmra.mxu0 %vm378_vm1, %v693_v38  ;;  %1241 = vmatmul.mubr.msk.f32.vlgmr.msra.gmra.mxu1 %vm378_vm1, %v693_v38 }
 0x31a   : > { %902 = vmatpush1.msra.mxu0 %v1177_v39  ;;  %935 = vmatprep.mubr.f32.mxu0 %v1457_v1 }
 0x31b   : > { %1244 = vmatpush3.msra.mxu1 %v1179_v40  ;;  %1245 = vmatprep.mubr.msk.f32.mxu1 %vm1458_vm0, %v1457_v1 }
 0x31d   : > { %1180 = vmatmul.mubr.msk.f32.vlgmr.msra.gmra.mxu0 %vm378_vm1, %v698_v41  ;;  %1246 = vmatmul.mubr.msk.f32.vlgmr.msra.gmra.mxu1 %vm378_vm1, %v698_v41 }
 0x3d9   : > { %v789_v48 = vpop.f32.mrf.mxu0  ;;  %v860_v49 = vpop.f32.mrf.mxu1 }
 0x3da   : > { %v790_v52 = vadd.f32 %v789_v48, %v708_v46  ;;  %v861_v27 = vadd.f32 %v860_v49, %v716_v25 }
 0x3db   : > { %v791_v50 = vpop.f32.mrf.mxu0  ;;  %v1242_v51 = vpop.f32.mrf.mxu1 }
 0x3dc   : > { %v792_v53 = vadd.f32 %v791_v50, %v712_v47 }
 0x3dd   : > { %v937_v54 = vpop.f32.mrf.mxu0  ;;  %v1008_v55 = vpop.f32.mrf.mxu1 }
 0x3de   : > { %v938_v56 = vadd.f32 %v937_v54, %v708_v46  ;;  %v1012_v57 = vmul.f32 %v792_v53, %v790_v52  ;;  %v1009_v28 = vadd.f32 %v1008_v55, %v716_v25 }
 0x3df   : > { %v939_v58 = vpop.f32.mrf.mxu0  ;;  %v1247_v59 = vpop.f32.mrf.mxu1 }
 0x3e0   : > { %v940_v60 = vadd.f32 %v939_v58, %v712_v47  ;;  %1016 = vadd.xlane.f32.xlu0 %v1012_v57  ;;  %v1014_v61 = vmul.f32 %v938_v56, %v792_v53 }
 0x3e2   : > { %1020 = vadd.xlane.f32.xlu1 %v1014_v61  ;;  %v1013_v62 = vmul.f32 %v940_v60, %v790_v52  ;;  %v1015_v63 = vmul.f32 %v940_v60, %v938_v56 }
 0x3e6   : > { %1018 = vadd.xlane.f32.xlu1 %v1013_v62 }
 0x3ea   : > { %1022 = vadd.xlane.f32.xlu1 %v1015_v63 }
 0x469   : > { %v1017_v1 = vpop.xlane.xlu0 %1016 }
 0x46a   : > { %v1024_v3 = vmul.f32 0.35355338, %v1017_v1 }
 0x46b   : > { %v1021_v0 = vpop.xlane.xlu1 %1020 }
 0x46c   : > { %v1026_v7 = vmul.f32 0.35355338, %v1021_v0 }
 0x46f   : > { %v1019_v2 = vpop.xlane.xlu1 %1018 }
 0x470   : > { %v1025_v4 = vmul.f32 0.35355338, %v1019_v2 }
 0x472   : > { %v1028_v5 = vmax.f32 %v1024_v3, %v1025_v4 }
 0x473   : > { %v1023_v6 = vpop.xlane.xlu1 %1022 }
 0x474   : > { %v1030_v8 = vsub.f32 %v1024_v3, %v1028_v5  ;;  %v1031_v9 = vsub.f32 %v1025_v4, %v1028_v5  ;;  %v1027_v10 = vmul.f32 0.35355338, %v1023_v6 }
 0x476   : > { %v1034_v11 = vmul.f32 1.442695, %v1030_v8  ;;  %v1036_v12 = vmul.f32 1.442695, %v1031_v9  ;;  %v1029_v13 = vmax.f32 %v1026_v7, %v1027_v10 }
 0x478   : > { %1318 = vpow2.f32 %v1034_v11  ;;  %v1032_v14 = vsub.f32 %v1026_v7, %v1029_v13  ;;  %v1033_v15 = vsub.f32 %v1027_v10, %v1029_v13 }
 0x479   : > { %1320 = vpow2.f32 %v1036_v12 }
 0x47a   : > { %v1038_v16 = vmul.f32 1.442695, %v1032_v14  ;;  %v1040_v17 = vmul.f32 1.442695, %v1033_v15 }
 0x47c   : > { %1322 = vpow2.f32 %v1038_v16 }
 0x47d   : > { %1324 = vpow2.f32 %v1040_v17 }
 0x485   : > { %v1319_v18 = vpop.eup %1318 }
 0x486   : > { %v1321_v19 = vpop.eup %1320 }
 0x487   : > { %v1042_v20 = vadd.f32 %v1321_v19, %v1319_v18 }
 0x489   : > { %v1323_v21 = vpop.eup %1322  ;;  %1326 = vrcp.f32 %v1042_v20 }
 0x48a   : > { %v1325_v22 = vpop.eup %1324 }
 0x48b   : > { %v1043_v23 = vadd.f32 %v1325_v22, %v1323_v21 }
 0x48d   : > { %1328 = vrcp.f32 %v1043_v23 }
 0x496   : > { %v1327_v26 = vpop.eup %1326 }
 0x497   : > { %v1046_v29 = vmul.f32 %v1327_v26, %v1319_v18  ;;  %v1047_v30 = vmul.f32 %v1327_v26, %v1321_v19 }
 0x499   : > { %v1050_v31 = vmul.f32 %v1046_v29, %v861_v27  ;;  %v1051_v32 = vmul.f32 %v1047_v30, %v1009_v28 }
 0x49a   : > { %v1329_v33 = vpop.eup %1328 }
 0x49b   : > { %v1048_v34 = vmul.f32 %v1329_v33, %v1323_v21  ;;  %v1049_v35 = vmul.f32 %v1329_v33, %v1325_v22  ;;  %v1054_v36 = vadd.f32 %v1051_v32, %v1050_v31 }
 0x49d   : > { %v1052_v37 = vmul.f32 %v1048_v34, %v861_v27  ;;  %v1053_v38 = vmul.f32 %v1049_v35, %v1009_v28 }
 0x49f   : > { %v1055_v39 = vadd.f32 %v1053_v38, %v1052_v37 }
 0x4a1   : > { %v1056_v40 = vadd.f32 %v1055_v39, %v1054_v36 }
 0x4a3   : > { %v1058_v41 = vmul.f32 0.5, %v1056_v40 }
 0x4a5   : > { %1059 = vst [vmem:[%s351_s25] sm:$0xff] %v1058_v41 }
 0x4a6   : > { %1395 = shalt.err (!%p1392_p1)
}
 0x4a7   : > { %s1396_s21 = scalar_lea.hbm %s1072_s29, 128  ;;  %s1400_s25 = scalar_lea.hbm %s1719_s9, 256 }
 0x4a8   : > { %p1397_p2 = scmp.ne.s32.totalorder %s1072_s29, %s1396_s21  ;;  %p1401_p5 = scmp.lt.s32.totalorder %s1072_s29, %s1719_s9 }
 0x4a9   : > { %p1402_p6 = scmp.lt.s32.totalorder %s1400_s25, %s1396_s21 }
 0x4aa   : > { %p1398_p3 = pnand %p1397_p2, %p1732_p13 }
 0x4ab   : > { %p1403_p10 = por %p1402_p6, %p1401_p5 }
 0x4ac   : > { %p1399_p9 = pneg %p1398_p3 }
 0x4ae   : > { %p1404_p12 = pnand %p1403_p10, %p1399_p9 }
 0x4b0   : > { %1407 = shalt.err (!%p1404_p12)
}
 0x4b1   : > { %1256 = dma.vmem_to_hbm [thread:$0]  (%p1732_p13), %s1075_s26, 128, %s1072_s29, %s1061_s14  }
 0x4b2 PF: > { %p1273_p4 = scmp.ge.s32.totalorder %s1450_s12, 2  ;;  %s1086_s16 = sand.u32 1, %s1438_s30  }
 0x4b3   : > { %p1733_p7 = scmp.ne.s32.totalorder %s1724_s20, 0  ;;  %s1087_s17 = scalar_lea.sflag [#allocation4], %s1086_s16 }
 0x4b5   : > { %p1266_p8 = pnand %p1273_p4, %p1733_p7 }
 0x4b7   : > { %p1267_p11 = pneg %p1266_p8 }
 0x4b9   : > { %1433 = dma.done.wait (%p1267_p11), %s1087_s17, 128  }
 0x4ba   : > { %1435 = vsyncadd (%p1267_p11), %s1087_s17, 4294967168  ;;  %p21_p0 = scmp.ge.s32.totalorder %s1535_s15, 4   ;;  %s1734_s30 = smov %s1442_s10 }
 0x4bb   : > { %s1735_s10 = smov %s1446_s11  ;;  %s1736_s11 = smov %s1546_s18 }
 0x4bc   : > { %s1737_s12 = smov %s1535_s15  ;;  %23 = sbr.rel (!%p21_p0) target bundleno = 5 (0x5), region = 102 }
 0x4c1   :  { %1092 = vsyncpa [#allocation3], 1 }
 0x4c2   :  { %1094 = vsyncpa [#allocation3 + $0x1], 1 }
 0x4c3   :  { %1095 = vsyncpa [#allocation6], 1 }
 0x4c4   :  { %1096 = vsyncpa [#allocation4], 1 }
 0x4c5   :  { %1098 = vsyncpa [#allocation4 + $0x1], 1 }

</bundles_post_ra>
